<compile_context>
chip_gen: v6e
topology: v6e:2x2x1
jax: 0.10.0
libtpu: 0.0.40
codegen_flags: <defaults>
</compile_context>

<pallas_src>
import numpy as np
import jax
import jax.numpy as jnp
from jax.experimental import pallas as pl
from jax.experimental.pallas import tpu as pltpu

# ----------------------------- configuration --------------------------------
FEATURE_DIM = 128           # module default 768; 128 keeps lanes dense at demo size
NUM_OBJECTS = 10
PERSON_CATEGORY_ID = 1
PATCH_SIZE = 14
MLP_H1, MLP_H2 = 512, 256
NUM_RELATIONS = 117
NUM_RELATIONS_PAD = 128     # lane-dense output width inside the MLP kernel
MLP_TILE_P = 128            # pair rows per grid step (amortizes MXU fill/drain)
MAX_GRID = 32               # max roi_align samples per axis (see TODO below)


# ---------------- Pallas kernel: fused upsample + roi_align(1x1) -------------
def _pool_kernel(w_ref, x_ref, o_ref):
    # w_ref: (N_pad, B*H*W) per-ROI fused (upsample o roi_align) weights
    # x_ref: (B*H*W, C)     backbone features, spatially flattened
    # o_ref: (N_pad, C)
    o_ref[...] = jnp.dot(w_ref[...], x_ref[...],
                         preferred_element_type=jnp.float32).astype(o_ref.dtype)


def _align_corners_matrix(n_in, n_out):
    """A (n_out, n_in) s.t. A @ x == 1-D linear resize with align_corners=True."""
    A = np.zeros((n_out, n_in), np.float32)
    if n_out == 1:
        A[0, 0] = 1.0
        return A
    scale = (n_in - 1) / (n_out - 1)
    for i in range(n_out):
        src = i * scale
        lo = min(int(np.floor(src)), n_in - 1)
        hi = min(lo + 1, n_in - 1)
        w = src - lo
        A[i, lo] += 1.0 - w
        A[i, hi] += w
    return A


def _axis_sample_weights(start, extent, n_grid, n_up):
    """Bilinear weight rows for the roi_align sample positions along one axis
    of the UPSAMPLED grid.  Returns (MAX_GRID, n_up); rows past n_grid or with
    out-of-range samples are zero (mirrors torchvision's validity test)."""
    i = jnp.arange(MAX_GRID, dtype=jnp.float32)
    coords = start + (i + 0.5) * extent / n_grid.astype(jnp.float32)
    in_grid = jnp.arange(MAX_GRID) < n_grid
    valid = jnp.logical_not((coords < -1.0) | (coords > n_up))
    c = jnp.maximum(coords, 0.0)
    lo = jnp.floor(c).astype(jnp.int32)
    at_edge = lo >= n_up - 1
    lo_c = jnp.where(at_edge, n_up - 1, lo)
    hi_c = jnp.where(at_edge, n_up - 1, lo + 1)
    cv = jnp.where(at_edge, jnp.float32(n_up - 1), c)
    frac = cv - lo_c.astype(jnp.float32)
    w = (in_grid & valid).astype(jnp.float32)
    oh_lo = jax.nn.one_hot(lo_c, n_up, dtype=jnp.float32)
    oh_hi = jax.nn.one_hot(hi_c, n_up, dtype=jnp.float32)
    return w[:, None] * ((1.0 - frac)[:, None] * oh_lo + frac[:, None] * oh_hi)


def fused_upsample_roi_pool(feats_nhwc, rois):
    """Equivalent to roi_align(F.interpolate(x, scale=2, bilinear,
    align_corners=True), rois, output_size=(1,1)), but fused via linearity.

    rois: (N, 5) packed exactly like the reference: (idx, ymin, xmin, ymax, xmax),
    which roi_align then reads as (idx, x1, y1, x2, y2).  That x/y swap is the
    reference module's own behaviour and is reproduced verbatim."""
    B, H, W, C = feats_nhwc.shape
    Ho, Wo = 2 * H, 2 * W
    Ah = jnp.asarray(_align_corners_matrix(H, Ho))      # (Ho, H)
    Aw = jnp.asarray(_align_corners_matrix(W, Wo))      # (Wo, W)

    def one_roi(roi):
        b = roi[0].astype(jnp.int32)
        x1, y1, x2, y2 = roi[1], roi[2], roi[3], roi[4]
        roi_w = jnp.maximum(x2 - x1, 1.0)
        roi_h = jnp.maximum(y2 - y1, 1.0)
        # TODO(synk): torchvision sampling_ratio=-1 uses ceil(extent) samples;
        # we cap at MAX_GRID (exact while ceil(extent) <= MAX_GRID).
        gh = jnp.clip(jnp.ceil(roi_h), 1, MAX_GRID).astype(jnp.int32)
        gw = jnp.clip(jnp.ceil(roi_w), 1, MAX_GRID).astype(jnp.int32)
        wy = _axis_sample_weights(y1, roi_h, gh, Ho) @ Ah   # (MAX_GRID, H)
        wx = _axis_sample_weights(x1, roi_w, gw, Wo) @ Aw   # (MAX_GRID, W)
        count = (gh * gw).astype(jnp.float32)
        w_hw = (wy.T @ wx) / count                           # (H, W)
        w_bhw = jax.nn.one_hot(b, B, dtype=jnp.float32)[:, None, None] * w_hw[None]
        return w_bhw.reshape(B * H * W)

    w_rois = jax.vmap(one_roi)(rois)                         # (N, B*H*W)
    N = w_rois.shape[0]
    N_pad = max(8, ((N + 7) // 8) * 8)                       # sublane alignment
    w_pad = jnp.zeros((N_pad, B * H * W), jnp.float32).at[:N].set(w_rois)
    x_flat = feats_nhwc.reshape(B * H * W, C).astype(jnp.float32)

    out = pl.pallas_call(
        _pool_kernel,
        out_shape=jax.ShapeDtypeStruct((N_pad, C), jnp.float32),
        grid_spec=pltpu.PrefetchScalarGridSpec(
            num_scalar_prefetch=0,
            grid=(1,),
            in_specs=[
                pl.BlockSpec((N_pad, B * H * W), lambda i: (0, 0)),
                pl.BlockSpec((B * H * W, C), lambda i: (0, 0)),
            ],
            out_specs=pl.BlockSpec((N_pad, C), lambda i: (0, 0)),
        ),
    )(w_pad, x_flat)
    return out[:N]


# ----------------------- Pallas kernel: fused 3-layer MLP --------------------
def _mlp_kernel(x_ref, w1_ref, b1_ref, w2_ref, b2_ref, w3_ref, b3_ref, o_ref):
    # bf16 matmuls on the MXU with f32 accumulation; bias + ReLU in f32.
    h = jnp.dot(x_ref[...], w1_ref[...], preferred_element_type=jnp.float32) + b1_ref[...]
    h = jnp.maximum(h, 0.0).astype(jnp.bfloat16)
    h = jnp.dot(h, w2_ref[...], preferred_element_type=jnp.float32) + b2_ref[...]
    h = jnp.maximum(h, 0.0).astype(jnp.bfloat16)
    o_ref[...] = (jnp.dot(h, w3_ref[...], preferred_element_type=jnp.float32)
                  + b3_ref[...]).astype(o_ref.dtype)


def mlp_forward(pairs, kernel_params):
    """pairs: (P, 2*FEATURE_DIM) f32 -> (P, NUM_RELATIONS) f32."""
    w1, b1, w2, b2, w3p, b3p = kernel_params
    P, D = pairs.shape
    P_pad = ((P + MLP_TILE_P - 1) // MLP_TILE_P) * MLP_TILE_P
    x = jnp.zeros((P_pad, D), jnp.bfloat16).at[:P].set(pairs.astype(jnp.bfloat16))

    out = pl.pallas_call(
        _mlp_kernel,
        out_shape=jax.ShapeDtypeStruct((P_pad, NUM_RELATIONS_PAD), jnp.float32),
        grid_spec=pltpu.PrefetchScalarGridSpec(
            num_scalar_prefetch=0,
            grid=(P_pad // MLP_TILE_P,),
            in_specs=[
                pl.BlockSpec((MLP_TILE_P, D), lambda i: (i, 0)),
                pl.BlockSpec((D, MLP_H1), lambda i: (0, 0)),      # weights resident
                pl.BlockSpec((1, MLP_H1), lambda i: (0, 0)),
                pl.BlockSpec((MLP_H1, MLP_H2), lambda i: (0, 0)),
                pl.BlockSpec((1, MLP_H2), lambda i: (0, 0)),
                pl.BlockSpec((MLP_H2, NUM_RELATIONS_PAD), lambda i: (0, 0)),
                pl.BlockSpec((1, NUM_RELATIONS_PAD), lambda i: (0, 0)),
            ],
            out_specs=pl.BlockSpec((MLP_TILE_P, NUM_RELATIONS_PAD), lambda i: (i, 0)),
        ),
        compiler_params=pltpu.CompilerParams(dimension_semantics=("parallel",)),
    )(x, w1, b1, w2, b2, w3p, b3p)
    return out[:P, :NUM_RELATIONS]


# ------------------------ host-side ROI / pair glue --------------------------
def prepare_rois(detections_batch, targets):
    """Mirror of prepare_rois_cpu (box conversion + scaling)."""
    scale = PATCH_SIZE / 2.0
    all_rois, additional_info, detection_counts = [], [], []
    for image_index, (det, tgt) in enumerate(zip(detections_batch, targets)):
        boxes = np.asarray(det["boxes"], np.float32)
        detection_counts.append(len(boxes))
        if boxes.size == 0:
            continue
        H, W = tgt["size"]
        cx, cy, bw, bh = boxes.T
        xmin = (cx - bw / 2.0) * W
        ymin = (cy - bh / 2.0) * H
        xmax = (cx + bw / 2.0) * W
        ymax = (cy + bh / 2.0) * H
        # NOTE: reference packs (idx, ymin, xmin, ymax, xmax) and hands that to
        # roi_align (which reads x1,y1,x2,y2) -- reproduced verbatim.
        rois = np.stack([np.full_like(ymin, image_index),
                         ymin / scale, xmin / scale, ymax / scale, xmax / scale], axis=1)
        all_rois.append(rois)
        for lab, roi, sc in zip(det["labels"], rois, det["scores"]):
            additional_info.append({
                "label": int(lab),
                "bbox": [float(roi[2]) * scale, float(roi[1]) * scale,
                         float(roi[4]) * scale, float(roi[3]) * scale],
                "image_index": image_index,
                "score": float(sc),
            })
    if not all_rois:
        return np.zeros((0, 5), np.float32), [], detection_counts
    return np.concatenate(all_rois).astype(np.float32), additional_info, detection_counts


def build_pairs(pooled, additional_info, detection_counts):
    """Mirror of the human/object pairing loop in forward()."""
    pooled = np.asarray(pooled)
    all_pairs, hoi_results, pair_start_indices = [], [], []
    current_index, cursor = 0, 0
    for count in detection_counts:
        feats = pooled[cursor:cursor + count]
        infos = additional_info[cursor:cursor + count]
        cursor += count
        humans, objects = [], []
        for f, d in zip(feats, infos):
            entry = (f.reshape(-1), d["score"], d["label"], d["bbox"])
            (humans if d["label"] == PERSON_CATEGORY_ID else objects).append(entry)
        humans.sort(key=lambda x: -x[1])
        objects.sort(key=lambda x: -x[1])
        humans = humans[:NUM_OBJECTS]
        objects = objects[:NUM_OBJECTS]
        pair_start_indices.append(current_index)
        for h in humans:
            for o in objects:
                all_pairs.append(np.concatenate([h[0], o[0]]))
                hoi_results.append({
                    "subject_category": h[2], "subject_score": h[1], "subject_bbox": h[3],
                    "object_category": o[2], "object_score": o[1], "object_bbox": o[3],
                })
                current_index += 1
    return all_pairs, hoi_results, pair_start_indices


# ------------------------------ model params ---------------------------------
def init_mlp_params(key):
    def linear(k, fan_in, fan_out):
        kw, kb = jax.random.split(k)
        bound = 1.0 / np.sqrt(fan_in)
        w = jax.random.uniform(kw, (fan_in, fan_out), jnp.float32, -bound, bound)
        b = jax.random.uniform(kb, (1, fan_out), jnp.float32, -bound, bound)
        return w, b
    k1, k2, k3 = jax.random.split(key, 3)
    w1, b1 = linear(k1, 2 * FEATURE_DIM, MLP_H1)
    w2, b2 = linear(k2, MLP_H1, MLP_H2)
    w3, b3 = linear(k3, MLP_H2, NUM_RELATIONS)
    return (w1, b1, w2, b2, w3, b3)


def prepare_mlp_kernel_params(params):
    """One-time: pad last layer 117 -> 128 lanes and cast weights to bf16."""
    w1, b1, w2, b2, w3, b3 = params
    pad = NUM_RELATIONS_PAD - NUM_RELATIONS
    w3p = jnp.pad(w3, ((0, 0), (0, pad)))
    b3p = jnp.pad(b3, ((0, 0), (0, pad)))
    return (w1.astype(jnp.bfloat16), b1,
            w2.astype(jnp.bfloat16), b2,
            w3p.astype(jnp.bfloat16), b3p)


# ------------------------------ model forward --------------------------------
def hoi_forward(backbone_features, targets, detections_batch, mlp_kernel_params):
    """backbone_features: (B, Hf, Wf, FEATURE_DIM) -- output of the backbone."""
    batch_size = backbone_features.shape[0]

    # prepare_rois_cpu equivalent (host)
    rois_np, additional_info, detection_counts = prepare_rois(detections_batch, targets)
    if rois_np.shape[0] == 0:
        return [[] for _ in range(batch_size)]

    # fused F.interpolate(x2, bilinear, align_corners=True) + roi_align((1,1))
    pooled = fused_upsample_roi_pool(backbone_features, jnp.asarray(rois_np))
    pooled = np.asarray(jax.device_get(pooled))

    # pairing loop (host)
    all_pairs, hoi_results, pair_start_indices = build_pairs(
        pooled, additional_info, detection_counts)
    if not all_pairs:
        return [[] for _ in range(batch_size)]

    # MLP  [fused Pallas kernel, bf16 MXU path]
    pairs_tensor = jnp.asarray(np.stack(all_pairs, axis=0), jnp.float32)
    relation_scores = mlp_forward(pairs_tensor, mlp_kernel_params)

    # Single device->host pull; NaN check on the numpy copy (no extra sync).
    scores_np = np.asarray(jax.device_get(relation_scores))
    if np.isnan(scores_np).any():
        raise ValueError("NaN detected in relation_scores.")

    for i in range(scores_np.shape[0]):
        hoi_results[i]["relation_score"] = scores_np[i]

    image_hoi_results = []
    for i in range(len(pair_start_indices)):
        start_idx = pair_start_indices[i]
        end_idx = (pair_start_indices[i + 1] if i + 1 < len(pair_start_indices)
                   else scores_np.shape[0])
        image_hoi_results.append([] if start_idx == end_idx
                                 else hoi_results[start_idx:end_idx])
    return image_hoi_results


# ----------------------------------- main ------------------------------------
if __name__ == "__main__":
    key = jax.random.PRNGKey(0)
    k_feat, k_mlp = jax.random.split(key)

    B, Hf, Wf = 2, 8, 8                       # backbone feature grid (small demo)
    features = jax.random.normal(k_feat, (B, Hf, Wf, FEATURE_DIM), jnp.float32)

    # image size = Hf * patch_size so scaled ROI coords land on the upsampled map
    targets = [{"size": (Hf * PATCH_SIZE, Wf * PATCH_SIZE)} for _ in range(B)]

    detections_batch = [
        {   # image 0: 3 humans (label 1), 2 objects
            "boxes": np.array([[0.30, 0.30, 0.20, 0.25],
                               [0.60, 0.50, 0.30, 0.30],
                               [0.50, 0.70, 0.20, 0.20],
                               [0.40, 0.40, 0.25, 0.30],
                               [0.70, 0.30, 0.20, 0.15]], np.float32),
            "labels": np.array([1, 1, 3, 5, 1], np.int64),
            "scores": np.array([0.95, 0.60, 0.80, 0.75, 0.40], np.float32),
        },
        {   # image 1: 2 humans, 3 objects
            "boxes": np.array([[0.25, 0.55, 0.30, 0.30],
                               [0.65, 0.35, 0.20, 0.25],
                               [0.45, 0.45, 0.35, 0.35],
                               [0.55, 0.65, 0.15, 0.20],
                               [0.35, 0.25, 0.25, 0.20]], np.float32),
            "labels": np.array([2, 1, 4, 1, 6], np.int64),
            "scores": np.array([0.85, 0.90, 0.70, 0.65, 0.55], np.float32),
        },
    ]

    mlp_params = init_mlp_params(k_mlp)
    mlp_kernel_params = prepare_mlp_kernel_params(mlp_params)

    results = hoi_forward(features, targets, detections_batch, mlp_kernel_params)

    # sanity: 3 humans x 2 objects = 6 pairs (img0), 2 x 3 = 6 pairs (img1)
    assert len(results) == B
    assert len(results[0]) == 6 and len(results[1]) == 6
    assert results[0][0]["relation_score"].shape == (NUM_RELATIONS,)
    jax.block_until_ready(jnp.asarray(results[0][0]["relation_score"]))
    print("KERNEL_OK")
</pallas_src>

<mosaic_0001>
module attributes {stable_mosaic.version = 11 : i64} {
  func.func @_pool_kernel(%arg0: i32, %arg1: memref<16x128xf32, #tpu.memory_space<vmem>>, %arg2: memref<128x128xf32, #tpu.memory_space<vmem>>, %arg3: memref<16x128xf32, #tpu.memory_space<vmem>>) attributes {dimension_semantics = [#tpu.dimension_semantics<arbitrary>], iteration_bounds = array<i64: 1>, scalar_prefetch = 0 : i64, scratch_operands = 0 : i64, tpu.core_type = #tpu.core_type<tc>, window_params = [{pipeline_mode = #tpu.pipeline_mode<synchronous>, transform_indices = @transform_0, window_bounds = array<i64: 16, 128>}, {pipeline_mode = #tpu.pipeline_mode<synchronous>, transform_indices = @transform_1, window_bounds = array<i64: 128, 128>}, {pipeline_mode = #tpu.pipeline_mode<synchronous>, transform_indices = @transform_2, window_bounds = array<i64: 16, 128>}]} {
    %c0 = arith.constant 0 : index
    %c0_0 = arith.constant 0 : index
    %0 = vector.load %arg1[%c0, %c0_0] : memref<16x128xf32, #tpu.memory_space<vmem>>, vector<16x128xf32>
    %c0_1 = arith.constant 0 : index
    %c0_2 = arith.constant 0 : index
    %1 = vector.load %arg2[%c0_1, %c0_2] : memref<128x128xf32, #tpu.memory_space<vmem>>, vector<128x128xf32>
    %cst = arith.constant dense<0.000000e+00> : vector<16x128xf32>
    %2 = tpu.matmul %0, %1, %cst {dimension_numbers = #tpu.dot_dimension_numbers<[1], [0], [0], [1], [0, 0, 1, 1], [], []>} : vector<16x128xf32>, vector<128x128xf32>, vector<16x128xf32> -> vector<16x128xf32>
    %c0_3 = arith.constant 0 : index
    %c0_4 = arith.constant 0 : index
    %3 = vector.load %arg3[%c0_3, %c0_4] : memref<16x128xf32, #tpu.memory_space<vmem>>, vector<16x128xf32>
    tpu.vector_store %arg3[%c0_3, %c0_4], %2 {strides = array<i32>} : memref<16x128xf32, #tpu.memory_space<vmem>>, vector<16x128xf32>,
    return
  }
  func.func @transform_0(%arg0: i32) -> (i32, i32) {
    %c0_i32 = arith.constant 0 : i32
    %c0_i32_0 = arith.constant 0 : i32
    %c0_i32_1 = arith.constant 0 : i32
    return %c0_i32, %c0_i32_0 : i32, i32
  }
  func.func @transform_1(%arg0: i32) -> (i32, i32) {
    %c0_i32 = arith.constant 0 : i32
    %c0_i32_0 = arith.constant 0 : i32
    %c0_i32_1 = arith.constant 0 : i32
    return %c0_i32, %c0_i32_0 : i32, i32
  }
  func.func @transform_2(%arg0: i32) -> (i32, i32) {
    %c0_i32 = arith.constant 0 : i32
    %c0_i32_0 = arith.constant 0 : i32
    %c0_i32_1 = arith.constant 0 : i32
    return %c0_i32, %c0_i32_0 : i32, i32
  }
}

</mosaic_0001>

<bundles_post_ra>
// kernel: tpu_custom_call.1
= control target key start
LH: loop header
LB: loop body
LE: loop exit
PB: predicated region body
PF: predicated region fallthrough
CT: control target
= control target key end

     0   :  { %7 = vsyncpa [#allocation3], 0  ;;  %s315_s0 = inlined_call_operand.hbm [shape: f32[16,128], index: 0, kind: input, shape index: {}]   ;;  %s316_s1 = inlined_call_operand.hbm [shape: f32[128,128], index: 1, kind: input, shape index: {}]   ;;  %s317_s2 = inlined_call_operand.hbm [shape: f32[16,128], index: 2, kind: output, shape index: {}]  }
   0x1   :  { %8 = vsyncpa [#allocation6], 0 }
   0x2   :  { %9 = vsyncpa [#allocation4], 0  ;;  %s277_s9 = smov [#allocation2]  }
   0x3   :  { %s15_s10 = sshll.u32 %s277_s9, 4  ;;  %s16_s10 = int_to_ptr.vmem [resolvable:$true] %s15_s10 }
   0x4   :  { %s219_s11 = scalar_lea.vmem %s16_s10, 256  ;;  %p224_p1 = scmp.lt.s32.totalorder %s16_s10, %s16_s10 }
   0x5   :  { %p220_p0 = scmp.ne.s32.totalorder %s16_s10, %s219_s11  ;;  %p225_p2 = scmp.lt.s32.totalorder %s219_s11, %s219_s11 }
   0x7   :  { %p226_p3 = por %p225_p2, %p224_p1 }
   0x9   :  { %p227_p4 = pnand %p226_p3, %p220_p0 }
   0xb   :  { %230 = shalt.err (!%p227_p4)
}
   0xc   :  { %s278_s12 = smov 128   ;;  %s279_s13 = smov 8  }
   0xd   :  { %21 = dma.hbm_to_vmem [thread:$0]  %s315_s0, 256, %s16_s10, [#allocation3], %s278_s12, %s278_s12, %s279_s13  }
   0xe   :  { %s280_s16 = smov [#allocation5]  }
   0xf   :  { %s27_s17 = sshll.u32 %s280_s16, 4  ;;  %s28_s17 = int_to_ptr.vmem [resolvable:$true] %s27_s17 }
  0x10   :  { %s239_s18 = scalar_lea.vmem %s28_s17, 2048  ;;  %p244_p6 = scmp.lt.s32.totalorder %s28_s17, %s28_s17 }
  0x11   :  { %p240_p5 = scmp.ne.s32.totalorder %s28_s17, %s239_s18  ;;  %p245_p7 = scmp.lt.s32.totalorder %s239_s18, %s239_s18 }
  0x13   :  { %p246_p8 = por %p245_p7, %p244_p6 }
  0x15   :  { %p247_p9 = pnand %p246_p8, %p240_p5 }
  0x17   :  { %250 = shalt.err (!%p247_p9)
}
  0x18   :  { %33 = dma.hbm_to_vmem [thread:$0]  %s316_s1, 2048, %s28_s17, [#allocation6], %s278_s12, %s278_s12, %s279_s13  }
  0x19   :  { %271 = dma.done.wait [#allocation3], 256  }
  0x1a   :  { %272 = vsyncadd [#allocation3], 4294967040 }
  0x1b   :  { %273 = dma.done.wait [#allocation6], 2048  }
  0x1c   :  { %274 = vsyncadd [#allocation6], 4294965248  ;;  %v57_v0 = vld [vmem:[#allocation5 + $0x78] sm:$0xff]  ;;  %v56_v1 = vld [vmem:[#allocation5 + $0x70] sm:$0xff]  ;;  %s281_s0 = smov [#allocation7]  }
  0x1d   :  { %171 = vmatprep.subr.mxu0 %v57_v0  ;;  %v55_v2 = vld [vmem:[#allocation5 + $0x68] sm:$0xff]  ;;  %v54_v3 = vld [vmem:[#allocation5 + $0x60] sm:$0xff]  ;;  %v40_v4 = vld [vmem:[#allocation2] sm:$0xff]  ;;  %s140_s1 = sshll.u32 %s281_s0, 4  ;;  %s141_s1 = int_to_ptr.vmem [resolvable:$true] %s140_s1 }
  0x1e   :  { %172 = vmatpush3.msra.mxu0 %v57_v0  ;;  %v53_v5 = vld [vmem:[#allocation5 + $0x58] sm:$0xff]  ;;  %203 = vmatprep.mubr.f32.mxu0 %v40_v4  ;;  %v52_v6 = vld [vmem:[#allocation5 + $0x50] sm:$0xff]  ;;  %v51_v7 = vld [vmem:[#allocation5 + $0x48] sm:$0xff]  ;;  %s251_s21 = scalar_lea.vmem %s141_s1, 256  ;;  %p256_p11 = scmp.lt.s32.totalorder %s141_s1, %s141_s1 }
  0x1f   :  { %173 = vmatprep.subr.mxu0 %v56_v1  ;;  %v50_v8 = vld [vmem:[#allocation5 + $0x40] sm:$0xff]  ;;  %v49_v9 = vld [vmem:[#allocation5 + $0x38] sm:$0xff]  ;;  %v48_v10 = vld [vmem:[#allocation5 + $0x30] sm:$0xff]  ;;  %p252_p10 = scmp.ne.s32.totalorder %s141_s1, %s251_s21  ;;  %p257_p12 = scmp.lt.s32.totalorder %s251_s21, %s251_s21 }
  0x20   :  { %174 = vmatpush3.msra.mxu0 %v56_v1  ;;  %v47_v11 = vld [vmem:[#allocation5 + $0x28] sm:$0xff]  ;;  %v46_v12 = vld [vmem:[#allocation5 + $0x20] sm:$0xff]  ;;  %v45_v13 = vld [vmem:[#allocation5 + $0x18] sm:$0xff] }
  0x21   :  { %175 = vmatprep.subr.mxu0 %v55_v2  ;;  %v44_v14 = vld [vmem:[#allocation5 + $0x10] sm:$0xff]  ;;  %v43_v15 = vld [vmem:[#allocation5 + $0x8] sm:$0xff]  ;;  %v42_v16 = vld [vmem:[#allocation5] sm:$0xff]  ;;  %p258_p13 = por %p257_p12, %p256_p11 }
  0x22   :  { %176 = vmatpush3.msra.mxu0 %v55_v2  ;;  %v41_v17 = vld [vmem:[#allocation2 + $0x8] sm:$0xff] }
  0x23   :  { %177 = vmatprep.subr.mxu0 %v54_v3  ;;  %p259_p0 = pnand %p258_p13, %p252_p10 }
  0x24   :  { %178 = vmatpush3.msra.mxu0 %v54_v3 }
  0x25   :  { %179 = vmatprep.subr.mxu0 %v53_v5 }
  0x26   :  { %180 = vmatpush3.msra.mxu0 %v53_v5 }
  0x27   :  { %181 = vmatprep.subr.mxu0 %v52_v6 }
  0x28   :  { %182 = vmatpush3.msra.mxu0 %v52_v6 }
  0x29   :  { %183 = vmatprep.subr.mxu0 %v51_v7 }
  0x2a   :  { %184 = vmatpush3.msra.mxu0 %v51_v7 }
  0x2b   :  { %185 = vmatprep.subr.mxu0 %v50_v8 }
  0x2c   :  { %186 = vmatpush3.msra.mxu0 %v50_v8 }
  0x2d   :  { %187 = vmatprep.subr.mxu0 %v49_v9 }
  0x2e   :  { %188 = vmatpush3.msra.mxu0 %v49_v9 }
  0x2f   :  { %189 = vmatprep.subr.mxu0 %v48_v10 }
  0x30   :  { %190 = vmatpush3.msra.mxu0 %v48_v10 }
  0x31   :  { %191 = vmatprep.subr.mxu0 %v47_v11 }
  0x32   :  { %192 = vmatpush3.msra.mxu0 %v47_v11 }
  0x33   :  { %193 = vmatprep.subr.mxu0 %v46_v12 }
  0x34   :  { %194 = vmatpush3.msra.mxu0 %v46_v12 }
  0x35   :  { %195 = vmatprep.subr.mxu0 %v45_v13 }
  0x36   :  { %196 = vmatpush3.msra.mxu0 %v45_v13 }
  0x37   :  { %197 = vmatprep.subr.mxu0 %v44_v14 }
  0x38   :  { %198 = vmatpush3.msra.mxu0 %v44_v14 }
  0x39   :  { %199 = vmatprep.subr.mxu0 %v43_v15 }
  0x3a   :  { %200 = vmatpush3.msra.mxu0 %v43_v15 }
  0x3b   :  { %201 = vmatprep.subr.mxu0 %v42_v16 }
  0x3c   :  { %202 = vmatpush3.msra.mxu0 %v42_v16 }
  0x3d   :  { %204 = vmatmul.mubr.f32.vlgmr.msra.gmra.mxu0 %v41_v17 }
  0xfd   :  { %v205_v18 = vpop.f32.mrf.mxu0 }
  0xfe   :  { %134 = vst [vmem:[#allocation7 + $0x8] sm:$0xff] %v205_v18 }
  0xff   :  { %v124_v19 = vpop.f32.mrf.mxu0 }
 0x100   :  { %133 = vst [vmem:[#allocation7] sm:$0xff] %v124_v19 }
 0x101   :  { %262 = shalt.err (!%p259_p0)
}
 0x102   :  { %146 = dma.vmem_to_hbm [thread:$0]  %s141_s1, 256, %s317_s2, [#allocation4], %s278_s12, %s278_s12, %s279_s13  }
 0x103   :  { %275 = dma.done.wait [#allocation4], 256  }
 0x104   :  { %276 = vsyncadd [#allocation4], 4294967040 }
 0x105   :  { %150 = vsyncpa [#allocation3], 1 }
 0x106   :  { %151 = vsyncpa [#allocation6], 1 }
 0x107   :  { %152 = vsyncpa [#allocation4], 1 }

</bundles_post_ra>
